<compile_context>
chip_gen: v5e
topology: v5e:2x2
jax: 0.10.0
libtpu: 0.0.40
codegen_flags: <defaults>
</compile_context>

<pallas_src>
import functools
import math

import numpy as np
import jax
import jax.numpy as jnp
from jax import lax
from jax.experimental import pallas as pl
from jax.experimental.pallas import tpu as pltpu


# ----------------------------------------------------------------------------
# Pallas kernel: one channel-tile of the concatenated embedding per grid step.
# ----------------------------------------------------------------------------
def _embedding_kernel(f2_ref, f3_ref, m2_ref, m3_ref, out_ref, *, nc2, compute_dtype):
    ct = pl.program_id(0)   # output channel-tile index: [0, nc2) -> layer2, [nc2, ...) -> layer3

    @pl.when(ct < nc2)
    def _():
        # pooled layer2 tile: (CT, S2) @ (S2, S2p) -> (CT, S2p)
        out_ref[0] = jnp.dot(
            f2_ref[0].astype(compute_dtype), m2_ref[...],
            preferred_element_type=jnp.float32,
        ).astype(out_ref.dtype)

    @pl.when(ct >= nc2)
    def _():
        # pooled + bilinearly-upsampled layer3 tile: (CT, S3) @ (S3, S2p) -> (CT, S2p)
        out_ref[0] = jnp.dot(
            f3_ref[0].astype(compute_dtype), m3_ref[...],
            preferred_element_type=jnp.float32,
        ).astype(out_ref.dtype)


# ----------------------------------------------------------------------------
# Host-side construction of the fused spatial operator matrices (numpy, cached per shape).
# ----------------------------------------------------------------------------
def _avgpool3_matrix(n: int) -> np.ndarray:
    """1-D factor of AvgPool2d(3,1,1): banded (n,n), 1/3 per in-range tap (zero pad, /9 total)."""
    i = np.arange(n)
    return (np.abs(i[:, None] - i[None, :]) <= 1).astype(np.float32) / 3.0


def _bilinear_matrix(out_size: int, in_size: int) -> np.ndarray:
    """F.interpolate(mode='bilinear', align_corners=False) along one axis as an (out, in) matrix."""
    o = np.arange(out_size, dtype=np.float64)
    src = (o + 0.5) * (float(in_size) / float(out_size)) - 0.5
    src = np.maximum(src, 0.0)
    i0 = np.minimum(np.floor(src).astype(np.int64), in_size - 1)
    i1 = np.minimum(i0 + 1, in_size - 1)
    w1 = src - i0
    w0 = 1.0 - w1
    m = np.zeros((out_size, in_size), np.float64)
    m[np.arange(out_size), i0] += w0
    m[np.arange(out_size), i1] += w1
    return m.astype(np.float32)


@functools.lru_cache(maxsize=None)
def _operator_matrices(h2, w2, h3, w3, s2_padded, dtype_name):
    """Returns (M2, M3) as device arrays; cached so the per-frame ROS loop never rebuilds them."""
    ph2, pw2 = _avgpool3_matrix(h2), _avgpool3_matrix(w2)
    ah = _bilinear_matrix(h2, h3) @ _avgpool3_matrix(h3)   # (H2, H3)
    aw = _bilinear_matrix(w2, w3) @ _avgpool3_matrix(w3)   # (W2, W3)
    m2 = np.kron(ph2, pw2).T                               # (S2, S2)
    m3 = np.kron(ah, aw).T                                 # (S3, S2)
    pad = s2_padded - h2 * w2
    if pad:                                                # lane-pad output columns with zeros
        m2 = np.pad(m2, ((0, 0), (0, pad)))
        m3 = np.pad(m3, ((0, 0), (0, pad)))
    dt = jnp.dtype(dtype_name)
    return jnp.asarray(m2, dtype=dt), jnp.asarray(m3, dtype=dt)


# ----------------------------------------------------------------------------
# Wrapper: pallas_call with a (channel-tile, batch) grid.
# ----------------------------------------------------------------------------
def patchcore_embedding(feat2: jax.Array, feat3: jax.Array, *,
                        compute_dtype=jnp.bfloat16,
                        out_dtype=None,
                        channel_tile: int | None = None) -> jax.Array:
    """feat2: (B, C2, H2, W2), feat3: (B, C3, H3, W3)  ->  (B, C2+C3, H2, W2) in out_dtype."""
    B, C2, H2, W2 = feat2.shape
    B3, C3, H3, W3 = feat3.shape
    assert B == B3
    S2, S3 = H2 * W2, H3 * W3
    S2p = ((S2 + 127) // 128) * 128          # lane-dense (unmasked vst) output columns
    out_dtype = compute_dtype if out_dtype is None else out_dtype

    if channel_tile is None:
        channel_tile = min(math.gcd(C2, C3), 512)   # e.g. 512 at real C2=512, C3=1024
    assert C2 % channel_tile == 0 and C3 % channel_tile == 0, (C2, C3, channel_tile)
    nc2, nc3 = C2 // channel_tile, C3 // channel_tile

    m2, m3 = _operator_matrices(H2, W2, H3, W3, S2p, jnp.dtype(compute_dtype).name)

    # Flatten spatial so H*W sits on the 128-lane axis (row-major reshape: no data movement).
    # Features keep their native dtype (no extra HBM convert pass); cast happens in-kernel.
    f2 = feat2.reshape(B, C2, S2)
    f3 = feat3.reshape(B, C3, S3)

    kernel = functools.partial(_embedding_kernel, nc2=nc2, compute_dtype=compute_dtype)

    flops = 2 * B * (C2 * S2 * S2p + C3 * S3 * S2p)
    bytes_accessed = (f2.size * f2.dtype.itemsize + f3.size * f3.dtype.itemsize
                      + m2.size * m2.dtype.itemsize + m3.size * m3.dtype.itemsize
                      + B * (C2 + C3) * S2p * jnp.dtype(out_dtype).itemsize)

    out = pl.pallas_call(
        kernel,
        out_shape=jax.ShapeDtypeStruct((B, C2 + C3, S2p), out_dtype),
        grid_spec=pltpu.PrefetchScalarGridSpec(
            num_scalar_prefetch=0,
            # channel-tile axis leading so v7x megacore shards it even at B=1
            grid=(nc2 + nc3, B),
            in_specs=[
                # Clamped index maps: while the other layer's tiles run, the index does not
                # change, so the pipeline reuses the resident buffer instead of re-DMAing.
                pl.BlockSpec((1, channel_tile, S2),
                             lambda ct, b: (b, jnp.minimum(ct, nc2 - 1), 0)),
                pl.BlockSpec((1, channel_tile, S3),
                             lambda ct, b: (b, jnp.maximum(ct - nc2, 0), 0)),
                # Constant index maps: operator matrices stay resident across the whole grid.
                pl.BlockSpec((S2, S2p), lambda ct, b: (0, 0)),
                pl.BlockSpec((S3, S2p), lambda ct, b: (0, 0)),
            ],
            out_specs=pl.BlockSpec((1, channel_tile, S2p), lambda ct, b: (b, ct, 0)),
        ),
        compiler_params=pltpu.CompilerParams(
            dimension_semantics=("parallel", "parallel"),
            vmem_limit_bytes=32 * 1024 * 1024,
        ),
        cost_estimate=pl.CostEstimate(flops=flops, transcendentals=0,
                                      bytes_accessed=bytes_accessed),
    )(f2, f3, m2, m3)

    if S2p != S2:
        out = out[..., :S2]
    return out.reshape(B, C2 + C3, H2, W2)


# ----------------------------------------------------------------------------
# Helpers (plain-JAX glue)
# ----------------------------------------------------------------------------
# TODO(synk): the real backbone is an opaque TorchScript checkpoint (torch.jit.load) and the
# ROS subscriber/publisher + PIL/JPEG preprocessing have no Pallas equivalent; a small
# deterministic conv stub stands in and produces 'layer2'/'layer3'-style feature maps
# (layer3 at half the spatial resolution of layer2).
def stub_backbone(x: jax.Array, key: jax.Array):
    C2, C3 = 16, 32
    k1, k2 = jax.random.split(key)
    w1 = jax.random.normal(k1, (C2, x.shape[1], 3, 3), jnp.float32) * 0.1
    w2 = jax.random.normal(k2, (C3, C2, 3, 3), jnp.float32) * 0.1
    dn = ('NCHW', 'OIHW', 'NCHW')
    f2 = lax.conv_general_dilated(x, w1, window_strides=(4, 4), padding=((1, 1), (1, 1)),
                                  dimension_numbers=dn)
    f2 = jnp.maximum(f2, 0.0)
    f3 = lax.conv_general_dilated(f2, w2, window_strides=(2, 2), padding=((1, 1), (1, 1)),
                                  dimension_numbers=dn)
    f3 = jnp.maximum(f3, 0.0)
    return f2, f3


def reference_embedding(feat2: jax.Array, feat3: jax.Array) -> jax.Array:
    """Pure-JAX f32 reference of avgpool(3,1,1) + bilinear upsample + concat."""
    def avgpool(f):
        fp = jnp.pad(f, ((0, 0), (0, 0), (1, 1), (1, 1)))
        H, W = f.shape[2], f.shape[3]
        acc = jnp.zeros_like(f)
        for dy in range(3):
            for dx in range(3):
                acc = acc + fp[:, :, dy:dy + H, dx:dx + W]
        return acc / 9.0

    p2 = avgpool(feat2.astype(jnp.float32))
    p3 = avgpool(feat3.astype(jnp.float32))
    H2, W2 = p2.shape[2], p2.shape[3]
    wh = jnp.asarray(_bilinear_matrix(H2, p3.shape[2]))
    ww = jnp.asarray(_bilinear_matrix(W2, p3.shape[3]))
    up = jnp.einsum('oh,bchw,vw->bcov', wh, p3, ww, precision=lax.Precision.HIGHEST)
    return jnp.concatenate([p2, up], axis=1)


# ----------------------------------------------------------------------------
# Main
# ----------------------------------------------------------------------------
if __name__ == "__main__":
    key = jax.random.PRNGKey(0)
    kx, kw = jax.random.split(key)

    # small stand-in for the 1x3x224x224 sonar image
    x = jax.random.uniform(kx, (2, 3, 64, 64), jnp.float32)   # NCHW

    feat2, feat3 = stub_backbone(x, kw)        # (2, 16, 16, 16), (2, 32, 8, 8)
    ref = jax.block_until_ready(reference_embedding(feat2, feat3))

    # f32 compute / f32 output: numerically faithful to the PyTorch module.
    emb32 = jax.block_until_ready(
        patchcore_embedding(feat2, feat3, compute_dtype=jnp.float32, out_dtype=jnp.float32))
    assert emb32.shape == ref.shape, (emb32.shape, ref.shape)
    err32 = float(jnp.max(jnp.abs(emb32 - ref)))
    assert jnp.allclose(emb32, ref, atol=1e-2, rtol=1e-2), err32

    # Default path: bf16 compute + bf16 output (halves the dominant HBM write stream),
    # f32 accumulation on the MXU; jitted so the output slice/reshape fuses.
    emb16 = jax.block_until_ready(jax.jit(patchcore_embedding)(feat2, feat3))
    assert emb16.shape == ref.shape, (emb16.shape, ref.shape)
    err16 = float(jnp.max(jnp.abs(emb16.astype(jnp.float32) - ref)))
    assert jnp.allclose(emb16.astype(jnp.float32), ref, atol=5e-2, rtol=5e-2), err16

    print("KERNEL_OK")
</pallas_src>

<mosaic_0001>
module attributes {stable_mosaic.version = 11 : i64} {
  func.func @_embedding_kernel(%arg0: i32, %arg1: i32, %arg2: memref<1x16x256xf32, #tpu.memory_space<vmem>>, %arg3: memref<1x16x64xf32, #tpu.memory_space<vmem>>, %arg4: memref<256x256xf32, #tpu.memory_space<vmem>>, %arg5: memref<64x256xf32, #tpu.memory_space<vmem>>, %arg6: memref<1x16x256xf32, #tpu.memory_space<vmem>>) attributes {dimension_semantics = [#tpu.dimension_semantics<parallel>, #tpu.dimension_semantics<parallel>], iteration_bounds = array<i64: 3, 2>, scalar_prefetch = 0 : i64, scratch_operands = 0 : i64, tpu.core_type = #tpu.core_type<tc>, window_params = [{transform_indices = @transform_0, window_bounds = array<i64: 1, 16, 256>}, {transform_indices = @transform_1, window_bounds = array<i64: 1, 16, 64>}, {pipeline_mode = #tpu.pipeline_mode<synchronous>, transform_indices = @transform_2, window_bounds = array<i64: 256, 256>}, {pipeline_mode = #tpu.pipeline_mode<synchronous>, transform_indices = @transform_3, window_bounds = array<i64: 64, 256>}, {transform_indices = @transform_4, window_bounds = array<i64: 1, 16, 256>}]} {
    %c1_i32 = arith.constant 1 : i32
    %0 = arith.cmpi slt, %arg0, %c1_i32 : i32
    %1 = arith.extui %0 : i1 to i32
    %c0_i32 = arith.constant 0 : i32
    %2 = arith.cmpi ne, %1, %c0_i32 : i32
    scf.if %2 {
      %c0 = arith.constant 0 : index
      %c0_2 = arith.constant 0 : index
      %c0_3 = arith.constant 0 : index
      %6 = vector.load %arg2[%c0, %c0_2, %c0_3] : memref<1x16x256xf32, #tpu.memory_space<vmem>>, vector<1x16x256xf32>
      %7 = vector.shape_cast %6 : vector<1x16x256xf32> to vector<16x256xf32>
      %c0_4 = arith.constant 0 : index
      %c0_5 = arith.constant 0 : index
      %8 = vector.load %arg4[%c0_4, %c0_5] : memref<256x256xf32, #tpu.memory_space<vmem>>, vector<256x256xf32>
      %cst = arith.constant dense<0.000000e+00> : vector<16x256xf32>
      %9 = tpu.matmul %7, %8, %cst {dimension_numbers = #tpu.dot_dimension_numbers<[1], [0], [0], [1], [0, 0, 1, 1], [], []>} : vector<16x256xf32>, vector<256x256xf32>, vector<16x256xf32> -> vector<16x256xf32>
      %c0_6 = arith.constant 0 : index
      %c0_7 = arith.constant 0 : index
      %c0_8 = arith.constant 0 : index
      %10 = vector.load %arg6[%c0_6, %c0_7, %c0_8] : memref<1x16x256xf32, #tpu.memory_space<vmem>>, vector<1x16x256xf32>
      %11 = vector.shape_cast %10 : vector<1x16x256xf32> to vector<16x256xf32>
      %12 = vector.shape_cast %9 : vector<16x256xf32> to vector<1x16x256xf32>
      tpu.vector_store %arg6[%c0_6, %c0_7, %c0_8], %12 {strides = array<i32>} : memref<1x16x256xf32, #tpu.memory_space<vmem>>, vector<1x16x256xf32>,
    } else {
    }
    %c1_i32_0 = arith.constant 1 : i32
    %3 = arith.cmpi sge, %arg0, %c1_i32_0 : i32
    %4 = arith.extui %3 : i1 to i32
    %c0_i32_1 = arith.constant 0 : i32
    %5 = arith.cmpi ne, %4, %c0_i32_1 : i32
    scf.if %5 {
      %c0 = arith.constant 0 : index
      %c0_2 = arith.constant 0 : index
      %c0_3 = arith.constant 0 : index
      %6 = vector.load %arg3[%c0, %c0_2, %c0_3] : memref<1x16x64xf32, #tpu.memory_space<vmem>>, vector<1x16x64xf32>
      %7 = vector.shape_cast %6 : vector<1x16x64xf32> to vector<16x64xf32>
      %c0_4 = arith.constant 0 : index
      %c0_5 = arith.constant 0 : index
      %8 = vector.load %arg5[%c0_4, %c0_5] : memref<64x256xf32, #tpu.memory_space<vmem>>, vector<64x256xf32>
      %cst = arith.constant dense<0.000000e+00> : vector<16x256xf32>
      %9 = tpu.matmul %7, %8, %cst {dimension_numbers = #tpu.dot_dimension_numbers<[1], [0], [0], [1], [0, 0, 1, 1], [], []>} : vector<16x64xf32>, vector<64x256xf32>, vector<16x256xf32> -> vector<16x256xf32>
      %c0_6 = arith.constant 0 : index
      %c0_7 = arith.constant 0 : index
      %c0_8 = arith.constant 0 : index
      %10 = vector.load %arg6[%c0_6, %c0_7, %c0_8] : memref<1x16x256xf32, #tpu.memory_space<vmem>>, vector<1x16x256xf32>
      %11 = vector.shape_cast %10 : vector<1x16x256xf32> to vector<16x256xf32>
      %12 = vector.shape_cast %9 : vector<16x256xf32> to vector<1x16x256xf32>
      tpu.vector_store %arg6[%c0_6, %c0_7, %c0_8], %12 {strides = array<i32>} : memref<1x16x256xf32, #tpu.memory_space<vmem>>, vector<1x16x256xf32>,
    } else {
    }
    return
  }
  func.func @transform_0(%arg0: i32, %arg1: i32) -> (i32, i32, i32) {
    %c0_i32 = arith.constant 0 : i32
    %0 = arith.minsi %arg0, %c0_i32 : i32
    %c0_i32_0 = arith.constant 0 : i32
    %c0_i32_1 = arith.constant 0 : i32
    return %arg1, %0, %c0_i32_0 : i32, i32, i32
  }
  func.func @transform_1(%arg0: i32, %arg1: i32) -> (i32, i32, i32) {
    %c1_i32 = arith.constant 1 : i32
    %0 = arith.subi %arg0, %c1_i32 : i32
    %c0_i32 = arith.constant 0 : i32
    %1 = arith.maxsi %0, %c0_i32 : i32
    %c0_i32_0 = arith.constant 0 : i32
    %c0_i32_1 = arith.constant 0 : i32
    return %arg1, %1, %c0_i32_0 : i32, i32, i32
  }
  func.func @transform_2(%arg0: i32, %arg1: i32) -> (i32, i32) {
    %c0_i32 = arith.constant 0 : i32
    %c0_i32_0 = arith.constant 0 : i32
    %c0_i32_1 = arith.constant 0 : i32
    return %c0_i32, %c0_i32_0 : i32, i32
  }
  func.func @transform_3(%arg0: i32, %arg1: i32) -> (i32, i32) {
    %c0_i32 = arith.constant 0 : i32
    %c0_i32_0 = arith.constant 0 : i32
    %c0_i32_1 = arith.constant 0 : i32
    return %c0_i32, %c0_i32_0 : i32, i32
  }
  func.func @transform_4(%arg0: i32, %arg1: i32) -> (i32, i32, i32) {
    %c0_i32 = arith.constant 0 : i32
    %c0_i32_0 = arith.constant 0 : i32
    return %arg1, %arg0, %c0_i32 : i32, i32, i32
  }
}

</mosaic_0001>

<bundles_post_ra>
// kernel: tpu_custom_call.1
= control target key start
LH: loop header
LB: loop body
LE: loop exit
PB: predicated region body
PF: predicated region fallthrough
CT: control target
= control target key end

     0   :  { %s1584_s0 = inlined_call_operand.hbm [shape: f32[2,16,256], index: 0, kind: input, shape index: {}]   ;;  %s1585_s1 = inlined_call_operand.hbm [shape: f32[2,32,64], index: 1, kind: input, shape index: {}]   ;;  %s1586_s2 = inlined_call_operand.hbm [shape: f32[256,256], index: 2, kind: input, shape index: {}]   ;;  %s1587_s3 = inlined_call_operand.hbm [shape: f32[64,256], index: 3, kind: input, shape index: {}]   ;;  %s1588_s4 = inlined_call_operand.hbm [shape: f32[2,48,256], index: 4, kind: output, shape index: {}]  }
   0x1   :  { %1603 = sst [smem:[#allocation28_spill]] %s1586_s2 }
   0x2   :  { %1604 = sst [smem:[#allocation29_spill]] %s1587_s3 }
   0x3   :  { %1605 = sst [smem:[#allocation30_spill]] %s1588_s4 }
   0x4   :  { %9 = vsyncpa [#allocation3], 0 }
   0x5   :  { %11 = vsyncpa [#allocation3 + $0x1], 0 }
   0x6   :  { %12 = vsyncpa [#allocation6], 0 }
   0x7   :  { %14 = vsyncpa [#allocation6 + $0x1], 0 }
   0x8   :  { %15 = vsyncpa [#allocation9], 0 }
   0x9   :  { %16 = vsyncpa [#allocation4], 0 }
   0xa   :  { %18 = vsyncpa [#allocation4 + $0x1], 0  ;;  %s1267_s15 = smov 0   ;;  %s1269_s16 = smov 0  }
   0xb   :  { %s1271_s17 = smov 0   ;;  %s1273_s18 = smov 0  }
   0xc   :  { %s1275_s19 = smov 0   ;;  %s1277_s20 = smov 0  }
   0xd   :  { %s1279_s21 = smov 0   ;;  %s1281_s22 = smov 0  }
   0xe   :  { %s1283_s23 = smov 0   ;;  %s1285_s24 = smov 0  }
   0xf   :  { %s1287_s25 = smov 0   ;;  %s1289_s26 = smov 0  }
  0x10   :  { %s1291_s27 = smov 0   ;;  %s1293_s28 = smov 0  }
  0x11 LB: > { %1606 = sst [smem:[#allocation16_spill]] %s1180_s15  ;;  %s1336_s29 = sadd.s32 4294967295, %s1232_s28   ;;  %s1232_s28 = sphi %s1293_s28, %s24_s28   ;;  %s1228_s27 = sphi %s1291_s27, %s1649_s27   ;;  %s1224_s26 = sphi %s1289_s26, %s1648_s26   ;;  %s1220_s25 = sphi %s1287_s25, %s1647_s25   ;;  %s1216_s24 = sphi %s1285_s24, %s1660_s24   ;;  %s1212_s23 = sphi %s1283_s23, %s1659_s23   ;;  %s1208_s22 = sphi %s1281_s22, %s1658_s22   ;;  %s1204_s21 = sphi %s1279_s21, %s1657_s21   ;;  %s1200_s20 = sphi %s1277_s20, %s1656_s20   ;;  %s1196_s19 = sphi %s1275_s19, %s1655_s19   ;;  %s1192_s18 = sphi %s1273_s18, %s1654_s18   ;;  %s1188_s17 = sphi %s1271_s17, %s1653_s17   ;;  %s1184_s16 = sphi %s1269_s16, %s1652_s16   ;;  %s1180_s15 = sphi %s1267_s15, %s1651_s15  }
  0x12   : > { %1607 = sst [smem:[#allocation17_spill]] %s1212_s23  ;;  %s741_s30 = sadd.s32 4294967294, %s1232_s28  }
  0x13   : > { %1608 = sst [smem:[#allocation18_spill]] %s1216_s24  ;;  %p1601_p0 = scmp.eq.s32.totalorder %s1336_s29, 0 }
  0x14   : > { %1609 = sst [smem:[#allocation19_spill]] %s1220_s25  ;;  %p96_p1 = scmp.ne.s32.totalorder %s1196_s19, %s1192_s18 }
  0x15   : > { %1610 = sst [smem:[#allocation20_spill]] %s1224_s26  ;;  %p163_p2 = scmp.ne.s32.totalorder %s1188_s17, %s1184_s16 }
  0x16   : > { %1611 = sst [smem:[#allocation21_spill]] %s1228_s27  ;;  %p164_p3 = scmp.eq.s32.totalorder %s1336_s29, 5 }
  0x17   : > { %p1346_p4 = por %p96_p1, %p1601_p0  ;;  %p169_p5 = scmp.ne.s32.totalorder %s1184_s16, %s1180_s15 }
  0x18   : > { %p1352_p6 = por %p164_p3, %p163_p2  ;;  %p170_p7 = scmp.eq.s32.totalorder %s741_s30, 5 }
  0x19   : > { %p744_p8 = scmp.ge.s32.totalorder %s1232_s28, 1  ;;  %p177_p9 = scmp.lt.s32.totalorder %s1232_s28, 7 }
  0x1a   : > { %s1613_s6 = scalar_select %p1352_p6, 1, 0 }
  0x1b   : > { %p1358_p10 = por %p170_p7, %p169_p5  ;;  %p1362_p11 = pnand %p744_p8, %p177_p9 }
  0x1c   : > { %1614 = sst [smem:[#allocation22_spill]] %s1613_s6  ;;  %s1234_s12 = smov [#allocation7]  }
  0x1d   : > { %s1615_s7 = scalar_select %p1358_p10, 1, 0 }
  0x1e   : > { %s1618_s2 = sld [smem:[#allocation28_spill]]  ;;  %p809_p12 = pneg %p1362_p11 }
  0x1f   : > { %1616 = sst [smem:[#allocation23_spill]] %s1615_s7  ;;  %s190_s13 = sshll.u32 %s1234_s12, 4  ;;  %s191_s13 = int_to_ptr.vmem [resolvable:$true] %s190_s13 }
  0x20   : > { %p810_p13 = pnand %p809_p12, %p1601_p0  ;;  %s1619_s3 = sld [smem:[#allocation29_spill]] }
  0x21   : > { %s1589_s9 = smov 256   ;;  %s1590_s10 = smov 16  }
  0x22   : > { %s1237_s12 = smov [#allocation8]   ;;  %s33_s14 = sadd.s32 1, %s1224_s26 }
  0x23   : > { %p34_p1 = scmp.ge.s32.totalorder %s33_s14, 2  ;;  %s36_s18 = sadd.s32 1, %s1228_s27 }
  0x24   : > { %s188_s11 = sshll.u32 %s1618_s2, 4  ;;  %s204_s2 = sshll.u32 %s1237_s12, 4  ;;  %s189_s11 = int_to_ptr.hbm [resolvable:$true] %s188_s11  ;;  %s205_s2 = int_to_ptr.vmem [resolvable:$true] %s204_s2 }
  0x25   : > { %812 = dma.hbm_to_vmem [thread:$0]  (!%p810_p13), %s189_s11, 8192, %s191_s13, [#allocation6], %s1589_s9, %s1589_s9, %s1590_s10  }
  0x26   : > { %s202_s30 = sshll.u32 %s1619_s3, 4  ;;  %s49_s3 = sadd.s32 1, %s1212_s23  ;;  %s203_s30 = int_to_ptr.hbm [resolvable:$true] %s202_s30 }
  0x27   : > { %815 = dma.hbm_to_vmem [thread:$0]  (!%p810_p13), %s203_s30, 2048, %s205_s2, [#allocation9], %s1589_s9, %s1589_s9, %s1590_s10  }
  0x28   : > { %s1662_s14 = smov (%p34_p1, %s33_s14), 0  ;;  %s1664_s18 = smov (!%p34_p1, %s36_s18), %s1228_s27 }
  0x29   : > { %1620 = sst [smem:[#allocation24_spill]] %s1662_s14  ;;  %p38_p2 = scmp.ge.s32.totalorder %s1664_s18, 3 }
  0x2a   : > { %s44_s11 = ssub.s32 %s1224_s26, %s1662_s14  ;;  %p56_p3 = scmp.ne.s32.totalorder %s1212_s23, %s1208_s22 }
  0x2b   : > { %p57_p5 = scmp.eq.s32.totalorder %s1232_s28, 0  ;;  %s1666_s18 = smov (%p38_p2, %s1664_s18), 0 }
  0x2c   : > { %1621 = sst [smem:[#allocation25_spill]] %s1666_s18  ;;  %p62_p8 = scmp.ne.s32.totalorder %s1208_s22, %s1204_s21 }
  0x2d   : > { %p1397_p7 = por %p57_p5, %p56_p3  ;;  %s742_s13 = sadd.s32 4294967295, %s1228_s27 }
  0x2e   : > { %p1406_p9 = por %p1601_p0, %p62_p8  ;;  %p73_p12 = scmp.gt.s32.totalorder %s742_s13, 0 }
  0x2f   : > { %s743_s12 = sadd.s32 4294967295, %s1666_s18  ;;  %p47_p1 = scmp.eq.s32.totalorder %s44_s11, 0 }
  0x30   : > { %s1668_s13 = smov (!%p73_p12, %s742_s13), 0  ;;  %p76_p13 = scmp.gt.s32.totalorder %s743_s12, 0 }
  0x31   : > { %s149_s9 = ssub.s32 %s1228_s27, %s1666_s18  ;;  %s153_s15 = sadd.s32 1, %s1188_s17 }
  0x32   : > { %s1670_s12 = smov (!%p76_p13, %s743_s12), 0  ;;  %s150_s14 = sor.u32 %s149_s9, %s44_s11 }
  0x33   : > { %s1414_s21 = scalar_select %p47_p1, %s1212_s23, %s49_s3  }
  0x34   : > { %s79_s10 = ssub.s32 %s1668_s13, %s1670_s12  ;;  %p151_p2 = scmp.eq.s32.totalorder %s150_s14, 0 }
  0x35   : > { %1624 = sst [smem:[#allocation26_spill]] %s1414_s21  ;;  %s1416_s7 = sor.u32 %s79_s10, %s44_s11 }
  0x36   : > { %p81_p3 = scmp.eq.s32.totalorder %s1416_s7, 0  ;;  %p1602_p8 = scmp.lt.s32.totalorder %s1232_s28, 6 }
  0x37   : > { %s1421_s4 = scalar_select %p151_p2, %s1188_s17, %s153_s15  }
  0x38   : > { %s218_s6 = sand.u32 1, %s1212_s23   ;;  %s751_s18 = sshll.u32 %s1224_s26, 2 }
  0x39   : > { %1625 = sst [smem:[#allocation27_spill]] %s1421_s4  ;;  %s748_s24 = sshll.u32 %s218_s6, 5 }
  0x3a   : > { %s222_s27 = scalar_lea.vmem [#allocation2], %s748_s24  ;;  %s1177_s3 = sshll.u32 %s1224_s26, 5 }
  0x3b   : > { %s235_s25 = sshll.u32 %s222_s27, 4  ;;  %p1431_p12 = pnand %p1602_p8, %p1397_p7  ;;  %s236_s25 = int_to_ptr.vmem [resolvable:$true] %s235_s25 }
  0x3c   : > { %s232_s15 = scalar_lea.hbm %s1584_s0, %s1177_s3  ;;  %s755_s11 = sshll.u32 %s1668_s13, 1 }
  0x3d   : > { %s233_s12 = sshll.u32 %s232_s15, 4  ;;  %s257_s21 = sadd.s32 %s755_s11, %s751_s18  ;;  %s234_s12 = int_to_ptr.hbm [resolvable:$true] %s233_s12 }
  0x3e   : > { %s219_s23 = scalar_lea.sflag [#allocation3], %s218_s6  ;;  %s1013_s24 = sshra.s32 %s234_s12, 4  ;;  %s1014_s24 = int_to_ptr.hbm [resolvable:$true] %s1013_s24 }
  0x3f   : > { %s1015_s27 = scalar_lea.hbm %s1014_s24, 32  ;;  %p1017_p1 = pneg %p1431_p12 }
  0x40   : > { %p1016_p13 = scmp.ne.s32.totalorder %s1014_s24, %s1015_s27  ;;  %s1020_s4 = scalar_lea.hbm %s1584_s0, 64 }
  0x41   : > { %p1022_p0 = scmp.lt.s32.totalorder %s1020_s4, %s1015_s27 }
  0x42   : > { %p1018_p7 = pnand %p1017_p1, %p1016_p13 }
  0x44   : > { %p1019_p2 = pneg %p1018_p7 }
  0x46   : > { %p1024_p8 = pnand %p1022_p0, %p1019_p2 }
  0x48   : > { %1027 = shalt.err (!%p1024_p8)
}
  0x49   : > { %s1627_s13 = smov 16   ;;  %s1628_s18 = smov 256  }
  0x4a   : > { %819 = dma.hbm_to_vmem [thread:$0]  (!%p1431_p12), %s234_s12, 512, %s236_s25, %s219_s23, %s1628_s18, %s1628_s18, %s1627_s13  }
  0x4b   : > { %s757_s26 = sshll.u32 %s257_s21, 3  ;;  %s83_s10 = sadd.s32 1, %s1200_s20 }
  0x4c   : > { %s259_s3 = scalar_lea.hbm %s1585_s1, %s757_s26  ;;  %p90_p0 = scmp.ne.s32.totalorder %s1200_s20, %s1196_s19 }
  0x4d   : > { %s1457_s9 = scalar_select %p81_p3, %s1200_s20, %s83_s10  }
  0x4e   : > { %p92_p8 = por %p90_p0, %p57_p5  ;;  %s245_s14 = sand.u32 1, %s1232_s28  }
  0x4f   : > { %s247_s15 = sand.u32 1, %s1200_s20   ;;  %s260_s24 = sshll.u32 %s259_s3, 4  ;;  %s261_s24 = int_to_ptr.hbm [resolvable:$true] %s260_s24 }
  0x50   : > { %s753_s11 = sshll.u32 %s247_s15, 4  ;;  %p1629_p12 = scmp.lt.s32.totalorder %s1232_s28, 6 }
  0x51   : > { %s249_s27 = scalar_lea.vmem [#allocation5], %s753_s11  ;;  %s246_s23 = scalar_lea.sflag [#allocation6], %s245_s14 }
  0x52   : > { %s262_s2 = sshll.u32 %s249_s27, 4  ;;  %p820_p13 = pnand %p1629_p12, %p92_p8  ;;  %s263_s2 = int_to_ptr.vmem [resolvable:$true] %s262_s2 }
  0x53   : > { %s1238_s25 = smov 128   ;;  %s1239_s21 = smov 8  }
  0x54   : > { %822 = dma.hbm_to_vmem [thread:$0]  (!%p820_p13), %s261_s24, 256, %s263_s2, %s246_s23, %s1238_s25, %s1238_s25, %s1239_s21  }
  0x55   : > { %274 = sbr.rel (%p1362_p11) target bundleno = 480 (0x1e0), region = 36  ;;  %s276_s7 = sand.u32 (!%p1362_p11), 1, %s1208_s22  }
  0x56   : > { %s759_s12 = sshll.u32 (!%p1362_p11), %s276_s7, 5  ;;  %s277_s13 = scalar_lea.sflag (!%p1362_p11), [#allocation3], %s276_s7 }
  0x57   : > { %s1468_s18 = scalar_lea.vmem (!%p1362_p11), [#allocation2], %s759_s12 }
  0x5a   : > { %1158 = dma.done.wait (%p1406_p9), %s277_s13, 512  }
  0x5b   : > { %1160 = vsyncadd (%p1406_p9), %s277_s13, 4294966784  ;;  %s286_s26 = sand.u32 1, %s1336_s29   ;;  %s288_s6 = sand.u32 1, %s1196_s19  }
  0x5c   : > { %s1476_s4 = sshll.u32 %s288_s6, 4  ;;  %s287_s8 = scalar_lea.sflag [#allocation6], %s286_s26 }
  0x5d   : > { %s290_s3 = scalar_lea.vmem [#allocation5], %s1476_s4 }
  0x5e   : > { %1162 = dma.done.wait (%p1346_p4), %s287_s8, 256  }
  0x5f   : > { %1164 = vsyncadd (%p1346_p4), %s287_s8, 4294967040  ;;  %p1630_p11 = scmp.eq.s32.totalorder %s1336_s29, 0 }
  0x61   : > { %1166 = dma.done.wait (%p1630_p11), [#allocation6], 8192   ;;  %p1631_p5 = pmov %p1630_p11 }
  0x63   : > { %1168 = vsyncadd (%p1631_p5), [#allocation6], 4294959104  ;;  %p1632_p9 = pmov %p1631_p5 }
  0x64   : > { %p1633_p3 = pmov %p1631_p5 }
  0x65   : > { %1170 = dma.done.wait (%p1632_p9), [#allocation9], 2048  }
  0x66   : > { %1172 = vsyncadd (%p1633_p3), [#allocation9], 4294965248  ;;  %s328_s30 = sand.u32 1, %s1184_s16   ;;  %s1634_s5 = sld [smem:[#allocation19_spill]] }
  0x67   : > { %s763_s10 = sshll.u32 %s328_s30, 5 }
  0x68   : > { %s1494_s14 = scalar_lea.vmem [#allocation10], %s763_s10 }
  0x6c   : > { %p764_p4 = scmp.ge.s32.totalorder %s1634_s5, 1 }
  0x6e   : > { %342 = sbr.rel (%p764_p4) target bundleno = 291 (0x123), region = 56 }
  0x73   : > { %v378_v0 = vld [vmem:[#allocation7 + $0xf8] sm:$0xff]  ;;  %v376_v2 = vld [vmem:[#allocation7 + $0xe8] sm:$0xff]  ;;  %v377_v6 = vld [vmem:[#allocation7 + $0xf0] sm:$0xff] }
  0x74   : > { %v410_v1 = vld [vmem:[#allocation7 + $0x1f8] sm:$0xff]  ;;  %457 = vmatpush.msra.mxu2 %v378_v0  ;;  %v408_v3 = vld [vmem:[#allocation7 + $0x1e8] sm:$0xff]  ;;  %v409_v7 = vld [vmem:[#allocation7 + $0x1f0] sm:$0xff]  ;;  %411 = vmatpush.msra.mxu0 %v377_v6 }
  0x75   : > { %480 = vmatpush.msra.mxu3 %v410_v1  ;;  %v374_v4 = vld [vmem:[#allocation7 + $0xd8] sm:$0xff]  ;;  %v375_v8 = vld [vmem:[#allocation7 + $0xe0] sm:$0xff]  ;;  %434 = vmatpush.msra.mxu1 %v409_v7  ;;  %v372_v10 = vld [vmem:[#allocation7 + $0xc8] sm:$0xff] }
  0x76   : > { %v406_v5 = vld [vmem:[#allocation7 + $0x1d8] sm:$0xff]  ;;  %458 = vmatpush.msra.mxu2 %v376_v2  ;;  %v407_v9 = vld [vmem:[#allocation7 + $0x1e0] sm:$0xff]  ;;  %v404_v11 = vld [vmem:[#allocation7 + $0x1c8] sm:$0xff]  ;;  %412 = vmatpush.msra.mxu0 %v375_v8 }
  0x77   : > { %481 = vmatpush.msra.mxu3 %v408_v3  ;;  %v373_v12 = vld [vmem:[#allocation7 + $0xd0] sm:$0xff]  ;;  %435 = vmatpush.msra.mxu1 %v407_v9  ;;  %v370_v14 = vld [vmem:[#allocation7 + $0xb8] sm:$0xff]  ;;  %v371_v16 = vld [vmem:[#allocation7 + $0xc0] sm:$0xff] }
  0x78   : > { %459 = vmatpush.msra.mxu2 %v374_v4  ;;  %v405_v13 = vld [vmem:[#allocation7 + $0x1d0] sm:$0xff]  ;;  %v402_v15 = vld [vmem:[#allocation7 + $0x1b8] sm:$0xff]  ;;  %v403_v17 = vld [vmem:[#allocation7 + $0x1c0] sm:$0xff]  ;;  %413 = vmatpush.msra.mxu0 %v373_v12 }
  0x79   : > { %482 = vmatpush.msra.mxu3 %v406_v5  ;;  %436 = vmatpush.msra.mxu1 %v405_v13  ;;  %v368_v18 = vld [vmem:[#allocation7 + $0xa8] sm:$0xff]  ;;  %v369_v20 = vld [vmem:[#allocation7 + $0xb0] sm:$0xff]  ;;  %v366_v22 = vld [vmem:[#allocation7 + $0x98] sm:$0xff] }
  0x7a   : > { %460 = vmatpush.msra.mxu2 %v372_v10  ;;  %v400_v19 = vld [vmem:[#allocation7 + $0x1a8] sm:$0xff]  ;;  %v401_v21 = vld [vmem:[#allocation7 + $0x1b0] sm:$0xff]  ;;  %414 = vmatpush.msra.mxu0 %v371_v16  ;;  %v398_v23 = vld [vmem:[#allocation7 + $0x198] sm:$0xff] }
  0x7b   : > { %483 = vmatpush.msra.mxu3 %v404_v11  ;;  %437 = vmatpush.msra.mxu1 %v403_v17  ;;  %v367_v24 = vld [vmem:[#allocation7 + $0xa0] sm:$0xff]  ;;  %v364_v26 = vld [vmem:[#allocation7 + $0x88] sm:$0xff]  ;;  %v365_v28 = vld [vmem:[#allocation7 + $0x90] sm:$0xff] }
  0x7c   : > { %461 = vmatpush.msra.mxu2 %v370_v14  ;;  %v399_v25 = vld [vmem:[#allocation7 + $0x1a0] sm:$0xff]  ;;  %415 = vmatpush.msra.mxu0 %v369_v20  ;;  %v396_v27 = vld [vmem:[#allocation7 + $0x188] sm:$0xff]  ;;  %v397_v29 = vld [vmem:[#allocation7 + $0x190] sm:$0xff] }
  0x7d   : > { %484 = vmatpush.msra.mxu3 %v402_v15  ;;  %438 = vmatpush.msra.mxu1 %v401_v21  ;;  %v362_v30 = vld [vmem:[#allocation7 + $0x78] sm:$0xff]  ;;  %v363_v32 = vld [vmem:[#allocation7 + $0x80] sm:$0xff]  ;;  %v360_v34 = vld [vmem:[#allocation7 + $0x68] sm:$0xff] }
  0x7e   : > { %462 = vmatpush.msra.mxu2 %v368_v18  ;;  %416 = vmatpush.msra.mxu0 %v367_v24  ;;  %v394_v31 = vld [vmem:[#allocation7 + $0x178] sm:$0xff]  ;;  %v395_v33 = vld [vmem:[#allocation7 + $0x180] sm:$0xff]  ;;  %v392_v35 = vld [vmem:[#allocation7 + $0x168] sm:$0xff] }
  0x7f   : > { %485 = vmatpush.msra.mxu3 %v400_v19  ;;  %439 = vmatpush.msra.mxu1 %v399_v25  ;;  %v361_v36 = vld [vmem:[#allocation7 + $0x70] sm:$0xff]  ;;  %v358_v38 = vld [vmem:[#allocation7 + $0x58] sm:$0xff]  ;;  %v359_v40 = vld [vmem:[#allocation7 + $0x60] sm:$0xff] }
  0x80   : > { %463 = vmatpush.msra.mxu2 %v366_v22  ;;  %417 = vmatpush.msra.mxu0 %v365_v28  ;;  %v393_v37 = vld [vmem:[#allocation7 + $0x170] sm:$0xff]  ;;  %v390_v39 = vld [vmem:[#allocation7 + $0x158] sm:$0xff]  ;;  %v391_v41 = vld [vmem:[#allocation7 + $0x160] sm:$0xff] }
  0x81   : > { %486 = vmatpush.msra.mxu3 %v398_v23  ;;  %440 = vmatpush.msra.mxu1 %v397_v29  ;;  %v356_v42 = vld [vmem:[#allocation7 + $0x48] sm:$0xff]  ;;  %v357_v44 = vld [vmem:[#allocation7 + $0x50] sm:$0xff]  ;;  %v354_v46 = vld [vmem:[#allocation7 + $0x38] sm:$0xff] }
  0x82   : > { %464 = vmatpush.msra.mxu2 %v364_v26  ;;  %418 = vmatpush.msra.mxu0 %v363_v32  ;;  %v388_v43 = vld [vmem:[#allocation7 + $0x148] sm:$0xff]  ;;  %v389_v45 = vld [vmem:[#allocation7 + $0x150] sm:$0xff]  ;;  %v386_v47 = vld [vmem:[#allocation7 + $0x138] sm:$0xff] }
  0x83   : > { %487 = vmatpush.msra.mxu3 %v396_v27  ;;  %441 = vmatpush.msra.mxu1 %v395_v33  ;;  %v355_v48 = vld [vmem:[#allocation7 + $0x40] sm:$0xff]  ;;  %v352_v50 = vld [vmem:[#allocation7 + $0x28] sm:$0xff]  ;;  %v353_v52 = vld [vmem:[#allocation7 + $0x30] sm:$0xff] }
  0x84   : > { %465 = vmatpush.msra.mxu2 %v362_v30  ;;  %419 = vmatpush.msra.mxu0 %v361_v36  ;;  %v387_v49 = vld [vmem:[#allocation7 + $0x140] sm:$0xff]  ;;  %v384_v51 = vld [vmem:[#allocation7 + $0x128] sm:$0xff]  ;;  %v385_v53 = vld [vmem:[#allocation7 + $0x130] sm:$0xff] }
  0x85   : > { %488 = vmatpush.msra.mxu3 %v394_v31  ;;  %442 = vmatpush.msra.mxu1 %v393_v37  ;;  %v350_v54 = vld [vmem:[#allocation7 + $0x18] sm:$0xff]  ;;  %v351_v56 = vld [vmem:[#allocation7 + $0x20] sm:$0xff]  ;;  %v348_v58 = vld [vmem:[#allocation7 + $0x8] sm:$0xff] }
  0x86   : > { %466 = vmatpush.msra.mxu2 %v360_v34  ;;  %420 = vmatpush.msra.mxu0 %v359_v40  ;;  %v382_v55 = vld [vmem:[#allocation7 + $0x118] sm:$0xff]  ;;  %v383_v57 = vld [vmem:[#allocation7 + $0x120] sm:$0xff]  ;;  %v380_v59 = vld [vmem:[#allocation7 + $0x108] sm:$0xff] }
  0x87   : > { %489 = vmatpush.msra.mxu3 %v392_v35  ;;  %443 = vmatpush.msra.mxu1 %v391_v41  ;;  %v343_v60 = vld [vmem:[%s1468_s18] sm:$0xff]  ;;  %v344_v61 = vld [vmem:[%s1468_s18 + $0x8] sm:$0xff]  ;;  %v349_v62 = vld [vmem:[#allocation7 + $0x10] sm:$0xff] }
  0x88   : > { %467 = vmatpush.msra.mxu2 %v358_v38  ;;  %421 = vmatpush.msra.mxu0 %v357_v44  ;;  %v381_v63 = vld [vmem:[#allocation7 + $0x110] sm:$0xff]  ;;  %v347_v0 = vld [vmem:[#allocation7] sm:$0xff]  ;;  %v346_v3 = vld [vmem:[%s1468_s18 + $0x18] sm:$0xff] }
  0x89   : > { %490 = vmatpush.msra.mxu3 %v390_v39  ;;  %444 = vmatpush.msra.mxu1 %v389_v45  ;;  %v379_v1 = vld [vmem:[#allocation7 + $0x100] sm:$0xff]  ;;  %v345_v2 = vld [vmem:[%s1468_s18 + $0x10] sm:$0xff] }
  0x8a   : > { %468 = vmatpush.msra.mxu2 %v356_v42  ;;  %422 = vmatpush.msra.mxu0 %v355_v48 }
  0x8b   : > { %491 = vmatpush.msra.mxu3 %v388_v43  ;;  %445 = vmatpush.msra.mxu1 %v387_v49 }
  0x8c   : > { %469 = vmatpush.msra.mxu2 %v354_v46  ;;  %423 = vmatpush.msra.mxu0 %v353_v52 }
  0x8d   : > { %492 = vmatpush.msra.mxu3 %v386_v47  ;;  %446 = vmatpush.msra.mxu1 %v385_v53 }
  0x8e   : > { %470 = vmatpush.msra.mxu2 %v352_v50  ;;  %424 = vmatpush.msra.mxu0 %v351_v56 }
  0x8f   : > { %493 = vmatpush.msra.mxu3 %v384_v51  ;;  %447 = vmatpush.msra.mxu1 %v383_v57 }
  0x90   : > { %471 = vmatpush.msra.mxu2 %v350_v54  ;;  %425 = vmatpush.msra.mxu0 %v349_v62 }
  0x91   : > { %494 = vmatpush.msra.mxu3 %v382_v55  ;;  %448 = vmatpush.msra.mxu1 %v381_v63 }
  0x92   : > { %472 = vmatpush.msra.mxu2 %v348_v58  ;;  %426 = vmatpush.msra.mxu0 %v347_v0 }
  0x93   : > { %495 = vmatpush.msra.mxu3 %v380_v59  ;;  %473 = vmatmul.f32.vlgmr.msra.gmra.mxu2 %v343_v60 }
  0x94   : > { %496 = vmatmul.f32.vlgmr.msra.gmra.mxu3 %v344_v61  ;;  %449 = vmatpush.msra.mxu1 %v379_v1 }
  0x95   : > { %427 = vmatmul.f32.vlgmr.msra.gmra.mxu0 %v343_v60  ;;  %450 = vmatmul.f32.vlgmr.msra.gmra.mxu1 %v344_v61 }
  0x9b   : > { %476 = vmatmul.f32.gmra.mxu2 %v345_v2 }
  0x9c   : > { %499 = vmatmul.f32.gmra.mxu3 %v346_v3 }
  0x9d   : > { %430 = vmatmul.f32.gmra.mxu0 %v345_v2  ;;  %453 = vmatmul.f32.gmra.mxu1 %v346_v3 }
 0x112   : > { %v428_v4 = vpop.f32.mrf.mxu0  ;;  %v451_v5 = vpop.f32.mrf.mxu1 }
 0x113   : > { %v452_v6 = vadd.f32 %v451_v5, %v428_v4 }
 0x115   : > { %503 = vst [vmem:[%s1494_s14] sm:$0xff] %v452_v6 }
 0x116   : > { %v474_v7 = vpop.f32.mrf.mxu2 }
 0x117   : > { %v497_v8 = vpop.f32.mrf.mxu3 }
 0x118   : > { %v498_v9 = vadd.f32 %v497_v8, %v474_v7 }
 0x11a   : > { %504 = vst [vmem:[%s1494_s14 + $0x8] sm:$0xff] %v498_v9  ;;  %v431_v10 = vpop.f32.mrf.mxu0  ;;  %v454_v11 = vpop.f32.mrf.mxu1 }
 0x11b   : > { %v455_v12 = vadd.f32 %v454_v11, %v431_v10 }
 0x11d   : > { %505 = vst [vmem:[%s1494_s14 + $0x10] sm:$0xff] %v455_v12 }
 0x11e   : > { %v477_v13 = vpop.f32.mrf.mxu2 }
 0x11f   : > { %v500_v14 = vpop.f32.mrf.mxu3 }
 0x120   : > { %v501_v15 = vadd.f32 %v500_v14, %v477_v13 }
 0x122   : > { %506 = vst [vmem:[%s1494_s14 + $0x18] sm:$0xff] %v501_v15 }
 0x123 PF: > { %s1635_s29 = sld [smem:[#allocation19_spill]] }
 0x129   : > { %p765_p1 = scmp.lt.s32.totalorder %s1635_s29, 1 }
 0x12b   : > { %510 = sbr.rel (%p765_p1) target bundleno = 454 (0x1c6), region = 60 }
 0x130   : > { %v527_v16 = vld [vmem:[#allocation8 + $0x70] sm:$0xff]  ;;  %v528_v17 = vld [vmem:[#allocation8 + $0x78] sm:$0xff]  ;;  %v525_v18 = vld [vmem:[#allocation8 + $0x60] sm:$0xff]  ;;  %vm529_vm0 = vcmask 523264  }
 0x131   : > { %778 = vmatpush.msra.mxu2 %v527_v16  ;;  %786 = vmatpush.msra.mxu3 %v528_v17  ;;  %v526_v19 = vld [vmem:[#allocation8 + $0x68] sm:$0xff]  ;;  %v523_v20 = vld [vmem:[#allocation8 + $0x50] sm:$0xff]  ;;  %v524_v21 = vld [vmem:[#allocation8 + $0x58] sm:$0xff] }
 0x132   : > { %544 = vmatpush.msra.mxu0 %v527_v16  ;;  %567 = vmatpush.msra.mxu1 %v528_v17  ;;  %v521_v22 = vld [vmem:[#allocation8 + $0x40] sm:$0xff]  ;;  %v522_v23 = vld [vmem:[#allocation8 + $0x48] sm:$0xff]  ;;  %v519_v24 = vld [vmem:[#allocation8 + $0x30] sm:$0xff] }
 0x133   : > { %779 = vmatpush.msra.mxu2 %v525_v18  ;;  %787 = vmatpush.msra.mxu3 %v526_v19  ;;  %v520_v25 = vld [vmem:[#allocation8 + $0x38] sm:$0xff]  ;;  %v517_v26 = vld [vmem:[#allocation8 + $0x20] sm:$0xff]  ;;  %v518_v27 = vld [vmem:[#allocation8 + $0x28] sm:$0xff] }
 0x134   : > { %545 = vmatpush.msra.mxu0 %v525_v18  ;;  %568 = vmatpush.msra.mxu1 %v526_v19  ;;  %v515_v28 = vld [vmem:[#allocation8 + $0x10] sm:$0xff]  ;;  %v516_v29 = vld [vmem:[#allocation8 + $0x18] sm:$0xff]  ;;  %v513_v30 = vld [vmem:[#allocation8] sm:$0xff] }
 0x135   : > { %780 = vmatpush.msra.mxu2 %v523_v20  ;;  %788 = vmatpush.msra.mxu3 %v524_v21  ;;  %v514_v31 = vld [vmem:[#allocation8 + $0x8] sm:$0xff]  ;;  %v511_v33 = vld [vmem:[%s290_s3] sm:$0xff] }
 0x136   : > { %546 = vmatpush.msra.mxu0 %v523_v20  ;;  %569 = vmatpush.msra.mxu1 %v524_v21  ;;  %v512_v32 = vld [vmem:[%s290_s3 + $0x8] sm:$0xff] }
 0x137   : > { %781 = vmatpush.msra.mxu2 %v521_v22  ;;  %789 = vmatpush.msra.mxu3 %v522_v23 }
 0x138   : > { %547 = vmatpush.msra.mxu0 %v521_v22  ;;  %570 = vmatpush.msra.mxu1 %v522_v23 }
 0x139   : > { %782 = vmatpush.msra.mxu2 %v519_v24  ;;  %790 = vmatpush.msra.mxu3 %v520_v25 }
 0x13a   : > { %548 = vmatpush.msra.mxu0 %v519_v24  ;;  %571 = vmatpush.msra.mxu1 %v520_v25 }
 0x13b   : > { %783 = vmatpush.msra.mxu2 %v517_v26  ;;  %791 = vmatpush.msra.mxu3 %v518_v27 }
 0x13c   : > { %549 = vmatpush.msra.mxu0 %v517_v26  ;;  %572 = vmatpush.msra.mxu1 %v518_v27 }
 0x13d   : > { %784 = vmatpush.msra.mxu2 %v515_v28  ;;  %792 = vmatpush.msra.mxu3 %v516_v29 }
 0x13e   : > { %550 = vmatpush.msra.mxu0 %v515_v28  ;;  %573 = vmatpush.msra.mxu1 %v516_v29 }
 0x13f   : > { %785 = vmatpush.msra.mxu2 %v513_v30  ;;  %793 = vmatpush.msra.mxu3 %v514_v31 }
 0x140   : > { %767 = vmatmul.msk.f32.vlgmr.msra.gmra.mxu2 %vm529_vm0, %v512_v32  ;;  %769 = vmatmul.msk.f32.vlgmr.msra.gmra.mxu3 %vm529_vm0, %v512_v32 }
 0x141   : > { %551 = vmatpush.msra.mxu0 %v513_v30  ;;  %574 = vmatpush.msra.mxu1 %v514_v31 }
 0x142   : > { %766 = vmatmul.msk.f32.vlgmr.msra.gmra.mxu0 %vm529_vm0, %v511_v33  ;;  %768 = vmatmul.msk.f32.vlgmr.msra.gmra.mxu1 %vm529_vm0, %v511_v33 }
 0x1bf   : > { %v553_v34 = vpop.f32.mrf.mxu0  ;;  %v576_v35 = vpop.f32.mrf.mxu1 }
 0x1c0   : > { %582 = vst [vmem:[%s1494_s14] sm:$0xff] %v553_v34 }
 0x1c1   : > { %583 = vst [vmem:[%s1494_s14 + $0x8] sm:$0xff] %v576_v35 }
 0x1c3   : > { %v556_v36 = vpop.f32.mrf.mxu2  ;;  %v579_v37 = vpop.f32.mrf.mxu3 }
 0x1c4   : > { %584 = vst [vmem:[%s1494_s14 + $0x10] sm:$0xff] %v556_v36 }
 0x1c5   : > { %585 = vst [vmem:[%s1494_s14 + $0x18] sm:$0xff] %v579_v37 }
 0x1c6 PF: > { %s1636_s15 = sld [smem:[#allocation19_spill]]  ;;  %s602_s23 = sshll.u32 %s1494_s14, 4  ;;  %s603_s23 = int_to_ptr.vmem [resolvable:$true] %s602_s23 }
 0x1c7   : > { %s1637_s11 = sld [smem:[#allocation18_spill]]  ;;  %s587_s6 = scalar_lea.sflag [#allocation4], %s328_s30 }
 0x1c8   : > { %s1639_s13 = sld [smem:[#allocation30_spill]] }
 0x1cc   : > { %s777_s27 = sshll.u32 %s1636_s15, 2 }
 0x1cd   : > { %s794_s2 = smul.u32 12, %s1637_s11 }
 0x1ce   : > { %s1093_s14 = scalar_lea.hbm %s1639_s13, 192 }
 0x1cf   : > { %s599_s25 = sadd.s32 %s794_s2, %s777_s27 }
 0x1d0   : > { %s773_s21 = sshll.u32 %s599_s25, 3 }
 0x1d1   : > { %s601_s18 = scalar_lea.hbm %s1639_s13, %s773_s21 }
 0x1d2   : > { %s604_s26 = sshll.u32 %s601_s18, 4  ;;  %s605_s26 = int_to_ptr.hbm [resolvable:$true] %s604_s26 }
 0x1d3   : > { %s1087_s4 = sshra.s32 %s605_s26, 4  ;;  %s1088_s4 = int_to_ptr.hbm [resolvable:$true] %s1087_s4 }
 0x1d4   : > { %s1089_s8 = scalar_lea.hbm %s1088_s4, 32  ;;  %p1094_p8 = scmp.lt.s32.totalorder %s1088_s4, %s1639_s13 }
 0x1d5   : > { %p1090_p7 = scmp.ne.s32.totalorder %s1088_s4, %s1089_s8  ;;  %p1095_p12 = scmp.lt.s32.totalorder %s1093_s14, %s1089_s8 }
 0x1d7   : > { %p1091_p2 = pnand %p1090_p7, %p1352_p6  ;;  %p1096_p13 = por %p1095_p12, %p1094_p8 }
 0x1d9   : > { %p1092_p0 = pneg %p1091_p2 }
 0x1db   : > { %p1097_p11 = pnand %p1096_p13, %p1092_p0 }
 0x1dd   : > { %1100 = shalt.err (!%p1097_p11)
}
 0x1de   : > { %s1240_s30 = smov 256   ;;  %s1241_s15 = smov 16  }
 0x1df   : > { %807 = dma.vmem_to_hbm [thread:$0]  (%p1352_p6), %s603_s23, 512, %s605_s26, %s587_s6, %s1240_s30, %s1240_s30, %s1241_s15  }
 0x1e0 PF: > { %s1640_s11 = sld [smem:[#allocation16_spill]]  ;;  %p832_p5 = scmp.ge.s32.totalorder %s1232_s28, 2 }
 0x1e2   : > { %p824_p9 = pnand %p832_p5, %p1358_p10 }
 0x1e4   : > { %p825_p3 = pneg %p824_p9 }
 0x1e6   : > { %s619_s2 = sand.u32 1, %s1640_s11  }
 0x1e7   : > { %s620_s25 = scalar_lea.sflag [#allocation4], %s619_s2 }
 0x1e8   : > { %1174 = dma.done.wait (%p825_p3), %s620_s25, 512  }
 0x1e9   : > { %1176 = vsyncadd (%p825_p3), %s620_s25, 4294966784  ;;  %s24_s28 = sadd.s32 1, %s1232_s28   ;;  %s1643_s24 = sld [smem:[#allocation27_spill]] }
 0x1ea   : > { %p1537_p4 = scmp.ge.s32.totalorder %s24_s28, 8   ;;  %s1644_s23 = sld [smem:[#allocation17_spill]] }
 0x1eb   : > { %s1645_s7 = sld [smem:[#allocation26_spill]]  ;;  %s1651_s15 = smov %s1184_s16 }
 0x1ec   : > { %s1646_s12 = sld [smem:[#allocation20_spill]]  ;;  %s1652_s16 = smov %s1188_s17 }
 0x1ed   : > { %s1647_s25 = sld [smem:[#allocation21_spill]]  ;;  %s1654_s18 = smov %s1196_s19 }
 0x1ee   : > { %s1648_s26 = sld [smem:[#allocation24_spill]]  ;;  %s1655_s19 = smov %s1200_s20 }
 0x1ef   : > { %s1649_s27 = sld [smem:[#allocation25_spill]]  ;;  %s1653_s17 = smov %s1643_s24 }
 0x1f0   : > { %s1656_s20 = smov %s1457_s9  ;;  %s1657_s21 = smov %s1208_s22 }
 0x1f1   : > { %s1658_s22 = smov %s1644_s23  ;;  %s1659_s23 = smov %s1645_s7 }
 0x1f2   : > { %s1660_s24 = smov %s1646_s12  ;;  %23 = sbr.rel (!%p1537_p4) target bundleno = 17 (0x11), region = 110 }
 0x1f7   :  { %626 = vsyncpa [#allocation3], 1 }
 0x1f8   :  { %628 = vsyncpa [#allocation3 + $0x1], 1 }
 0x1f9   :  { %629 = vsyncpa [#allocation6], 1 }
 0x1fa   :  { %631 = vsyncpa [#allocation6 + $0x1], 1 }
 0x1fb   :  { %632 = vsyncpa [#allocation9], 1 }
 0x1fc   :  { %633 = vsyncpa [#allocation4], 1 }
 0x1fd   :  { %635 = vsyncpa [#allocation4 + $0x1], 1 }

</bundles_post_ra>
